<compile_context>
chip_gen: v7x
topology: tpu7x:2x2x1
jax: 0.10.0
libtpu: 0.0.40
codegen_flags: <defaults>
</compile_context>

<pallas_src>
import jax
import jax.numpy as jnp
from jax.experimental import pallas as pl
from jax.experimental.pallas import tpu as pltpu


def _round_up(x: int, m: int) -> int:
    return ((x + m - 1) // m) * m


def _mlp_kernel(x_ref, w_ref, b_ref, o_ref, acc_ref):
    k = pl.program_id(2)

    @pl.when(k == 0)
    def _init():
        acc_ref[...] = jnp.zeros_like(acc_ref)

    # bf16 x bf16 -> f32 accumulate on the MXU.
    acc_ref[...] += jnp.dot(
        x_ref[...], w_ref[...], preferred_element_type=jnp.float32
    )

    @pl.when(k == pl.num_programs(2) - 1)
    def _epilogue():
        # f32 epilogue on the VPU: bias broadcast [1, tn] over [tm, tn], then ReLU.
        y = acc_ref[...] + b_ref[...]
        o_ref[...] = jnp.maximum(y, 0.0).astype(o_ref.dtype)


def mlp_forward(x, w_t, b, *, tm=None, tn=None, tk=None):
    """MLP forward: ReLU(x @ w_t + b).

    x:   [B, in_features]                (any float dtype)
    w_t: [in_features, out_features]     (torch weight pre-transposed ONCE, outside hot path)
    b:   [1, out_features]
    returns [B, out_features] in x.dtype.
    """
    B, K = x.shape
    Kw, N = w_t.shape
    assert Kw == K, "weight must be pre-transposed to [in_features, out_features]"
    assert b.shape == (1, N)

    out_dtype = x.dtype

    # Tile selection: lane-dense (multiples of 128 on the last dim), sublane multiple of
    # 16 on batch (bf16 packing). Capped so 2x(double-buffered) tiles stay ~1 MiB total,
    # well under the scoped-VMEM default on v5e (16 MiB), v6e (32 MiB) and v7x (32 MiB).
    tm = tm or min(128, _round_up(B, 16))
    tn = tn or min(256, _round_up(N, 128))
    tk = tk or min(512, _round_up(K, 128))

    B_pad = _round_up(B, tm)
    N_pad = _round_up(N, tn)
    K_pad = _round_up(K, tk)

    # Pad + cast once in the wrapper. Zero-padding along K contributes 0 to the dot.
    x_p = jnp.pad(x.astype(jnp.bfloat16), ((0, B_pad - B), (0, K_pad - K)))
    w_p = jnp.pad(w_t.astype(jnp.bfloat16), ((0, K_pad - K), (0, N_pad - N)))
    b_p = jnp.pad(b.astype(jnp.float32), ((0, 0), (0, N_pad - N)))

    grid = (B_pad // tm, N_pad // tn, K_pad // tk)

    cost = pl.CostEstimate(
        flops=2 * B_pad * N_pad * K_pad,
        transcendentals=0,
        bytes_accessed=(x_p.size * 2 + w_p.size * 2 + b_p.size * 4
                        + B_pad * N_pad * jnp.dtype(out_dtype).itemsize),
    )

    out_padded = pl.pallas_call(
        _mlp_kernel,
        out_shape=jax.ShapeDtypeStruct((B_pad, N_pad), out_dtype),
        grid_spec=pltpu.PrefetchScalarGridSpec(
            num_scalar_prefetch=0,
            grid=grid,
            in_specs=[
                pl.BlockSpec((tm, tk), lambda i, j, k: (i, k)),   # x tile
                pl.BlockSpec((tk, tn), lambda i, j, k: (k, j)),   # weight tile
                pl.BlockSpec((1, tn), lambda i, j, k: (0, j)),    # bias: constant over k
            ],
            out_specs=pl.BlockSpec((tm, tn), lambda i, j, k: (i, j)),
            scratch_shapes=[pltpu.VMEM((tm, tn), jnp.float32)],
        ),
        compiler_params=pltpu.CompilerParams(
            dimension_semantics=("parallel", "parallel", "arbitrary"),
        ),
        cost_estimate=cost,
    )(x_p, w_p, b_p)

    return out_padded[:B, :N]


if __name__ == "__main__":
    # Deterministic synthetic parameters (shapes implied by nn.Linear(in_size, out_size)).
    batch, in_size, out_size = 8, 32, 32
    key = jax.random.PRNGKey(0)
    kx, kw, kb = jax.random.split(key, 3)

    x = jax.random.normal(kx, (batch, in_size), dtype=jnp.float32)
    # torch.nn.Linear weight is [out, in]; init uniform(-1/sqrt(in), 1/sqrt(in)) like PyTorch.
    bound = 1.0 / (in_size ** 0.5)
    w = jax.random.uniform(kw, (out_size, in_size), jnp.float32, -bound, bound)
    b = jax.random.uniform(kb, (1, out_size), jnp.float32, -bound, bound)

    # Pre-transpose the weight ONCE outside the hot path (in a real model this is how the
    # parameter would be stored / jit-const'ed, avoiding a per-call XLA transpose).
    w_t = jnp.asarray(w.T)

    y = mlp_forward(x, w_t, b)
    jax.block_until_ready(y)

    # Reference checks.
    # (1) Tight check against the same bf16-rounded inputs (the MXU computes exact bf16
    #     products with f32 accumulation, so only accumulation order differs).
    x_bf = x.astype(jnp.bfloat16).astype(jnp.float32)
    w_bf = w_t.astype(jnp.bfloat16).astype(jnp.float32)
    y_ref_bf16_inputs = jnp.maximum(x_bf @ w_bf + b, 0.0)
    assert jnp.allclose(y, y_ref_bf16_inputs, atol=1e-4, rtol=1e-4), \
        "mismatch vs bf16-input reference"

    # (2) Loose check against the full-precision reference (bf16 input rounding error).
    y_ref_fp32 = jnp.maximum(x @ w.T + b, 0.0)
    assert jnp.allclose(y, y_ref_fp32, atol=5e-2, rtol=5e-2), \
        "mismatch vs f32 reference"

    print("KERNEL_OK")
</pallas_src>

<mosaic_0001>
module attributes {stable_mosaic.version = 11 : i64} {
  func.func @_mlp_kernel(%arg0: i32, %arg1: i32, %arg2: i32, %arg3: memref<16x128xbf16, #tpu.memory_space<vmem>>, %arg4: memref<128x128xbf16, #tpu.memory_space<vmem>>, %arg5: memref<1x128xf32, #tpu.memory_space<vmem>>, %arg6: memref<16x128xf32, #tpu.memory_space<vmem>>, %arg7: memref<16x128xf32, #tpu.memory_space<vmem>>) attributes {dimension_semantics = [#tpu.dimension_semantics<parallel>, #tpu.dimension_semantics<parallel>, #tpu.dimension_semantics<arbitrary>], iteration_bounds = array<i64: 1, 1, 1>, scalar_prefetch = 0 : i64, scratch_operands = 1 : i64, tpu.core_type = #tpu.core_type<tc>, window_params = [{transform_indices = @transform_0, window_bounds = array<i64: 16, 128>}, {transform_indices = @transform_1, window_bounds = array<i64: 128, 128>}, {transform_indices = @transform_2, window_bounds = array<i64: 1, 128>}, {transform_indices = @transform_3, window_bounds = array<i64: 16, 128>}]} {
    %c0_i32 = arith.constant 0 : i32
    %0 = arith.cmpi eq, %arg2, %c0_i32 : i32
    %1 = arith.extui %0 : i1 to i32
    %c0_i32_0 = arith.constant 0 : i32
    %2 = arith.cmpi ne, %1, %c0_i32_0 : i32
    scf.if %2 {
      %cst_10 = arith.constant 0.000000e+00 : f32
      %12 = vector.broadcast %cst_10 : f32 to vector<16x128xf32>
      %c0_11 = arith.constant 0 : index
      %c0_12 = arith.constant 0 : index
      %13 = vector.load %arg7[%c0_11, %c0_12] : memref<16x128xf32, #tpu.memory_space<vmem>>, vector<16x128xf32>
      tpu.vector_store %arg7[%c0_11, %c0_12], %12 {strides = array<i32>} : memref<16x128xf32, #tpu.memory_space<vmem>>, vector<16x128xf32>,
    } else {
    }
    %c0 = arith.constant 0 : index
    %c0_1 = arith.constant 0 : index
    %3 = vector.load %arg7[%c0, %c0_1] : memref<16x128xf32, #tpu.memory_space<vmem>>, vector<16x128xf32>
    %c0_2 = arith.constant 0 : index
    %c0_3 = arith.constant 0 : index
    %4 = vector.load %arg3[%c0_2, %c0_3] : memref<16x128xbf16, #tpu.memory_space<vmem>>, vector<16x128xbf16>
    %c0_4 = arith.constant 0 : index
    %c0_5 = arith.constant 0 : index
    %5 = vector.load %arg4[%c0_4, %c0_5] : memref<128x128xbf16, #tpu.memory_space<vmem>>, vector<128x128xbf16>
    %cst = arith.constant dense<0.000000e+00> : vector<16x128xf32>
    %6 = tpu.matmul %4, %5, %cst {dimension_numbers = #tpu.dot_dimension_numbers<[1], [0], [0], [1], [0, 0, 1, 1], [], []>} : vector<16x128xbf16>, vector<128x128xbf16>, vector<16x128xf32> -> vector<16x128xf32>
    %7 = arith.addf %3, %6 : vector<16x128xf32>
    %c0_6 = arith.constant 0 : index
    %c0_7 = arith.constant 0 : index
    %8 = vector.load %arg7[%c0_6, %c0_7] : memref<16x128xf32, #tpu.memory_space<vmem>>, vector<16x128xf32>
    tpu.vector_store %arg7[%c0_6, %c0_7], %7 {strides = array<i32>} : memref<16x128xf32, #tpu.memory_space<vmem>>, vector<16x128xf32>,
    %c0_i32_8 = arith.constant 0 : i32
    %9 = arith.cmpi eq, %arg2, %c0_i32_8 : i32
    %10 = arith.extui %9 : i1 to i32
    %c0_i32_9 = arith.constant 0 : i32
    %11 = arith.cmpi ne, %10, %c0_i32_9 : i32
    scf.if %11 {
      %c0_10 = arith.constant 0 : index
      %c0_11 = arith.constant 0 : index
      %12 = vector.load %arg7[%c0_10, %c0_11] : memref<16x128xf32, #tpu.memory_space<vmem>>, vector<16x128xf32>
      %c0_12 = arith.constant 0 : index
      %c0_13 = arith.constant 0 : index
      %13 = vector.load %arg5[%c0_12, %c0_13] : memref<1x128xf32, #tpu.memory_space<vmem>>, vector<1x128xf32>
      %14 = vector.broadcast %13 : vector<1x128xf32> to vector<16x128xf32>
      %15 = arith.addf %12, %14 : vector<16x128xf32>
      %cst_14 = arith.constant 0.000000e+00 : f32
      %16 = vector.broadcast %cst_14 : f32 to vector<16x128xf32>
      %17 = arith.maximumf %15, %16 : vector<16x128xf32>
      %c0_15 = arith.constant 0 : index
      %c0_16 = arith.constant 0 : index
      %18 = vector.load %arg6[%c0_15, %c0_16] : memref<16x128xf32, #tpu.memory_space<vmem>>, vector<16x128xf32>
      tpu.vector_store %arg6[%c0_15, %c0_16], %17 {strides = array<i32>} : memref<16x128xf32, #tpu.memory_space<vmem>>, vector<16x128xf32>,
    } else {
    }
    return
  }
  func.func @transform_0(%arg0: i32, %arg1: i32, %arg2: i32) -> (i32, i32) {
    %c0_i32 = arith.constant 0 : i32
    return %arg0, %arg2 : i32, i32
  }
  func.func @transform_1(%arg0: i32, %arg1: i32, %arg2: i32) -> (i32, i32) {
    %c0_i32 = arith.constant 0 : i32
    return %arg2, %arg1 : i32, i32
  }
  func.func @transform_2(%arg0: i32, %arg1: i32, %arg2: i32) -> (i32, i32) {
    %c0_i32 = arith.constant 0 : i32
    %c0_i32_0 = arith.constant 0 : i32
    return %c0_i32, %arg1 : i32, i32
  }
  func.func @transform_3(%arg0: i32, %arg1: i32, %arg2: i32) -> (i32, i32) {
    %c0_i32 = arith.constant 0 : i32
    return %arg0, %arg1 : i32, i32
  }
}

</mosaic_0001>

<bundles_post_ra>
// kernel: tpu_custom_call.1
= control target key start
LH: loop header
LB: loop body
LE: loop exit
PB: predicated region body
PF: predicated region fallthrough
CT: control target
= control target key end

     0   :  { %8 = vsyncpa [#allocation4], 0  ;;  %s402_s0 = inlined_call_operand.hbm [shape: bf16[16,128], index: 0, kind: input, shape index: {}]   ;;  %s403_s1 = inlined_call_operand.hbm [shape: bf16[128,128], index: 1, kind: input, shape index: {}]   ;;  %s404_s2 = inlined_call_operand.vmem [shape: f32[1,128], index: 2, kind: input, shape index: {}]   ;;  %s405_s3 = inlined_call_operand.hbm [shape: f32[16,128], index: 3, kind: output, shape index: {}]  }
   0x1   :  { %9 = vsyncpa [#allocation7], 0 }
   0x2   :  { %10 = vsyncpa [#allocation5], 0  ;;  %s334_s12 = smov [#allocation3]   ;;  %s262_s16 = scalar_lea.hbm %s402_s0, 128 }
   0x3   :  { %s16_s13 = sshll.u32 %s334_s12, 4  ;;  %p263_p0 = scmp.ne.s32.totalorder %s402_s0, %s262_s16  ;;  %s17_s13 = int_to_ptr.vmem [resolvable:$true] %s16_s13 }
   0x4   :  { %p266_p1 = scmp.lt.u32.totalorder %s262_s16, %s402_s0 }
   0x6   :  { %p268_p2 = pnand %p266_p1, %p263_p0 }
   0x8   :  { %271 = shalt.err (!%p268_p2)
}
   0x9   :  { %s272_s21 = scalar_lea.vmem %s17_s13, 128  ;;  %p277_p4 = scmp.lt.s32.totalorder %s17_s13, %s17_s13 }
   0xa   :  { %p273_p3 = scmp.ne.s32.totalorder %s17_s13, %s272_s21  ;;  %p278_p5 = scmp.lt.s32.totalorder %s272_s21, %s272_s21 }
   0xc   :  { %p279_p6 = por %p278_p5, %p277_p4 }
   0xe   :  { %p280_p7 = pnand %p279_p6, %p273_p3 }
  0x10   :  { %283 = shalt.err (!%p280_p7)
}
  0x11   :  { %s335_s22 = smov 64   ;;  %s336_s23 = smov 4  }
  0x12   :  { %22 = dma.hbm_to_vmem [thread:$0]  %s402_s0, 128, %s17_s13, [#allocation4], %s335_s22, %s335_s22, %s336_s23  }
  0x13   :  { %s337_s26 = smov [#allocation6]   ;;  %s284_s30 = scalar_lea.hbm %s403_s1, 1024 }
  0x14   :  { %s28_s27 = sshll.u32 %s337_s26, 4  ;;  %p285_p8 = scmp.ne.s32.totalorder %s403_s1, %s284_s30  ;;  %s29_s27 = int_to_ptr.vmem [resolvable:$true] %s28_s27 }
  0x15   :  { %p288_p9 = scmp.lt.u32.totalorder %s284_s30, %s403_s1 }
  0x17   :  { %p290_p10 = pnand %p288_p9, %p285_p8 }
  0x19   :  { %293 = shalt.err (!%p290_p10)
}
  0x1a   :  { %s294_s8 = scalar_lea.vmem %s29_s27, 1024  ;;  %p299_p12 = scmp.lt.s32.totalorder %s29_s27, %s29_s27 }
  0x1b   :  { %p295_p11 = scmp.ne.s32.totalorder %s29_s27, %s294_s8  ;;  %p300_p13 = scmp.lt.s32.totalorder %s294_s8, %s294_s8 }
  0x1d   :  { %p301_p0 = por %p300_p13, %p299_p12 }
  0x1f   :  { %p302_p1 = pnand %p301_p0, %p295_p11 }
  0x21   :  { %305 = shalt.err (!%p302_p1)
}
  0x22   :  { %34 = dma.hbm_to_vmem [thread:$0]  %s403_s1, 1024, %s29_s27, [#allocation7], %s335_s22, %s335_s22, %s336_s23  }
  0x23   :  { %328 = dma.done.wait [#allocation4], 128  }
  0x24   :  { %329 = vsyncadd [#allocation4], 4294967168 }
  0x25   :  { %330 = dma.done.wait [#allocation7], 1024  }
  0x26   :  { %331 = vsyncadd [#allocation7], 4294966272  ;;  %v338_v0 = vmov 0.0   ;;  %vm339_vm0 = vmmov 0   ;;  %v253_v1 = vld [vmem:[#allocation6] sm:$0xff]   ;;  %v254_v2 = vld [vmem:[#allocation6 + $0x8] sm:$0xff]  }
  0x27   :  { %224 = vmatprep.subr.bf16.mxu0 %v338_v0  ;;  %240 = vmatprep.mubr.msk.bf16.mxu0 %vm339_vm0, %v338_v0  ;;  %v255_v3 = vld [vmem:[#allocation6 + $0x10] sm:$0xff]   ;;  %v256_v4 = vld [vmem:[#allocation6 + $0x18] sm:$0xff]   ;;  %v257_v5 = vld [vmem:[#allocation6 + $0x20] sm:$0xff]   ;;  %s340_s11 = smov [#allocation8]  }
  0x28   :  { %225 = vmatpush3.bf16.msra.mxu0 %v253_v1  ;;  %v258_v6 = vld [vmem:[#allocation6 + $0x28] sm:$0xff]   ;;  %v259_v7 = vld [vmem:[#allocation6 + $0x30] sm:$0xff]   ;;  %v260_v8 = vld [vmem:[#allocation6 + $0x38] sm:$0xff]   ;;  %s192_s12 = sshll.u32 %s340_s11, 4  ;;  %s193_s12 = int_to_ptr.vmem [resolvable:$true] %s192_s12 }
  0x29   :  { %226 = vmatprep.subr.bf16.mxu0 %v338_v0  ;;  %v261_v9 = vld [vmem:[#allocation3] sm:$0xff]   ;;  %s306_s13 = scalar_lea.vmem %s193_s12, 256  ;;  %p311_p3 = scmp.lt.s32.totalorder %s193_s12, %s193_s12 }
  0x2a   :  { %v214_v10 = vld [vmem:[%s404_s2] ss:$0 sm:$0xff]  ;;  %p307_p2 = scmp.ne.s32.totalorder %s193_s12, %s306_s13  ;;  %p312_p4 = scmp.lt.s32.totalorder %s306_s13, %s306_s13 }
  0x2c   :  { %227 = vmatpush3.bf16.msra.mxu0 %v254_v2  ;;  %p313_p5 = por %p312_p4, %p311_p3 }
  0x2d   :  { %228 = vmatprep.subr.bf16.mxu0 %v338_v0 }
  0x2e   :  { %p314_p6 = pnand %p313_p5, %p307_p2 }
  0x30   :  { %229 = vmatpush3.bf16.msra.mxu0 %v255_v3 }
  0x31   :  { %230 = vmatprep.subr.bf16.mxu0 %v338_v0 }
  0x34   :  { %231 = vmatpush3.bf16.msra.mxu0 %v256_v4 }
  0x35   :  { %232 = vmatprep.subr.bf16.mxu0 %v338_v0 }
  0x38   :  { %233 = vmatpush3.bf16.msra.mxu0 %v257_v5 }
  0x39   :  { %234 = vmatprep.subr.bf16.mxu0 %v338_v0 }
  0x3c   :  { %235 = vmatpush3.bf16.msra.mxu0 %v258_v6 }
  0x3d   :  { %236 = vmatprep.subr.bf16.mxu0 %v338_v0 }
  0x40   :  { %237 = vmatpush3.bf16.msra.mxu0 %v259_v7 }
  0x41   :  { %238 = vmatprep.subr.bf16.mxu0 %v338_v0 }
  0x44   :  { %239 = vmatpush3.bf16.msra.mxu0 %v260_v8 }
  0x47   :  { %241 = vmatmul.mubr.bf16.vlgmr.msra.gmra.mrb[0].mxu0 %v261_v9 }
 0x11a   :  { %v158_v11 = vpop.f32.mrb[0].mxu0 }
 0x11b   :  { %v181_v12 = vadd.f32 %v214_v10, %v158_v11  ;;  %v242_v13 = vpop.f32.mrb[1].mxu0 }
 0x11c   :  { %v161_v14 = vpop.f32.mrb[2].mxu0 }
 0x11d   :  { %v183_v15 = vmax.f32 %v181_v12, 0.0  ;;  %v182_v16 = vadd.f32 %v214_v10, %v161_v14  ;;  %v243_v17 = vpop.f32.mrb[3].mxu0 }
 0x11f   :  { %185 = vst [vmem:[#allocation8] sm:$0xff] %v183_v15  ;;  %v184_v18 = vmax.f32 %v182_v16, 0.0 }
 0x121   :  { %186 = vst [vmem:[#allocation8 + $0x8] sm:$0xff] %v184_v18 }
 0x122   :  { %317 = shalt.err (!%p314_p6)
}
 0x123   :  { %s318_s15 = scalar_lea.hbm %s405_s3, 256 }
 0x124   :  { %p319_p7 = scmp.ne.s32.totalorder %s405_s3, %s318_s15  ;;  %p322_p8 = scmp.lt.u32.totalorder %s318_s15, %s405_s3 }
 0x126   :  { %p324_p9 = pnand %p322_p8, %p319_p7 }
 0x128   :  { %327 = shalt.err (!%p324_p9)
}
 0x129   :  { %s341_s20 = smov 128   ;;  %s342_s21 = smov 8  }
 0x12a   :  { %198 = dma.vmem_to_hbm [thread:$0]  %s193_s12, 256, %s405_s3, [#allocation5], %s341_s20, %s341_s20, %s342_s21  }
 0x12b   :  { %332 = dma.done.wait [#allocation5], 256  }
 0x12c   :  { %333 = vsyncadd [#allocation5], 4294967040 }
 0x12d   :  { %202 = vsyncpa [#allocation4], 1 }
 0x12e   :  { %203 = vsyncpa [#allocation7], 1 }
 0x12f   :  { %204 = vsyncpa [#allocation5], 1 }

</bundles_post_ra>
